<compile_context>
chip_gen: v7x
topology: tpu7x:2x2x1
jax: 0.10.0
libtpu: 0.0.40
codegen_flags: <defaults>
</compile_context>

<pallas_src>
import jax
import jax.numpy as jnp
from jax.experimental import pallas as pl
from jax.experimental.pallas import tpu as pltpu

_LANE = 128
_TARGET_TILE_BYTES = 2 * 1024 * 1024  # ~2 MiB per tile


def _hardsigmoid_kernel(x_ref, o_ref):
    # Scaled add of [x, ones] along the stacked dim -> (x + 1) * 0.5, written
    # with scalar immediates (no broadcast vreg fill per tile).
    o_ref[...] = x_ref[...] * 0.5 + 0.5


def _num_tensorcores() -> int:
    """2 on dual-TensorCore chips (v7x), else 1 (v5e / v6e)."""
    try:
        kind = jax.devices()[0].device_kind.lower()
    except Exception:
        return 1
    return 2 if "v7" in kind else 1


def _sublane_min(dtype) -> int:
    # f32 -> 8, bf16/f16 -> 16, int8/fp8 -> 32 (packed sublane granularity).
    return max(8, 32 // jnp.dtype(dtype).itemsize)


def fsu_hardsigmoid(x: jax.Array) -> jax.Array:
    """Elementwise (x + 1) / 2 via a Pallas TPU kernel (float dtypes, any shape)."""
    if not jnp.issubdtype(x.dtype, jnp.floating):
        raise TypeError(f"FSUHardsigmoid expects a floating dtype, got {x.dtype}")

    orig_shape = x.shape
    dtype = x.dtype
    n = x.size
    if n == 0:
        return x

    itemsize = jnp.dtype(dtype).itemsize
    sub = _sublane_min(dtype)
    num_tc = _num_tensorcores()
    cost = pl.CostEstimate(
        flops=2 * n, transcendentals=0, bytes_accessed=2 * n * itemsize)
    cparams = pltpu.CompilerParams(dimension_semantics=("parallel",))

    # Default row-major layout: ravel / reshape below are bitcasts (no HBM copy).
    x_flat = jnp.ravel(x)

    if n % _LANE == 0:
        # ---------------- aligned path: lane-dense (rows, lanes) slab ----------------
        lanes = _LANE
        for cand in (1024, 512, 256):
            if n % cand == 0 and n // cand >= sub:
                lanes = cand
                break
        rows = n // lanes
        x2d = x_flat.reshape(rows, lanes)

        # ~2 MiB tile, sublane-aligned.
        br = max(sub, (_TARGET_TILE_BYTES // (lanes * itemsize)) // sub * sub)
        if num_tc > 1:
            # v7x: cap the tile so both TensorCores get >= 2 pipelined steps.
            split = rows // (2 * num_tc)
            if split >= sub:
                br = min(br, split // sub * sub)
        if rows <= br:
            br = rows  # single full-extent block, no masking, grid=(1,)
        grid = (pl.cdiv(rows, br),)

        out2d = pl.pallas_call(
            _hardsigmoid_kernel,
            out_shape=jax.ShapeDtypeStruct((rows, lanes), dtype),
            grid_spec=pltpu.PrefetchScalarGridSpec(
                num_scalar_prefetch=0,
                grid=grid,
                in_specs=[pl.BlockSpec((br, lanes), lambda i: (i, 0))],
                out_specs=pl.BlockSpec((br, lanes), lambda i: (i, 0)),
            ),
            compiler_params=cparams,
            cost_estimate=cost,
        )(x2d)
        return out2d.reshape(orig_shape)

    # -------- ragged path (n % 128 != 0): run directly on the flat 1-D array --------
    max_single = _TARGET_TILE_BYTES // itemsize
    if n <= max_single:
        # Single full-extent 1-D block (no pad, no slice, no masking games).
        out_flat = pl.pallas_call(
            _hardsigmoid_kernel,
            out_shape=jax.ShapeDtypeStruct((n,), dtype),
            cost_estimate=cost,
        )(x_flat)
    else:
        # Large ragged tensors: 1-D blocked streaming; Pallas masks the ragged
        # final block, so still exactly one HBM read + one HBM write.
        granule = sub * _LANE
        blk = max(granule, (_TARGET_TILE_BYTES // itemsize) // granule * granule)
        grid = (pl.cdiv(n, blk),)
        out_flat = pl.pallas_call(
            _hardsigmoid_kernel,
            out_shape=jax.ShapeDtypeStruct((n,), dtype),
            grid_spec=pltpu.PrefetchScalarGridSpec(
                num_scalar_prefetch=0,
                grid=grid,
                in_specs=[pl.BlockSpec((blk,), lambda i: (i,))],
                out_specs=pl.BlockSpec((blk,), lambda i: (i,)),
            ),
            compiler_params=cparams,
            cost_estimate=cost,
        )(x_flat)
    return out_flat.reshape(orig_shape)


if __name__ == "__main__":
    key = jax.random.PRNGKey(0)
    # NCHW input, small shape: batch=2, channels=4, spatial=16x16 (aligned path)
    x = jax.random.uniform(key, (2, 4, 16, 16), dtype=jnp.float32,
                           minval=-1.0, maxval=1.0)
    y = jax.block_until_ready(fsu_hardsigmoid(x))
    ref = jnp.mean(jnp.stack([x, jnp.ones_like(x)], axis=0), axis=0)
    assert y.shape == x.shape and y.dtype == x.dtype
    assert jnp.allclose(y, ref, atol=1e-6), "mismatch vs reference (aligned path)"

    # Ragged flat size (n % 128 != 0) exercises the copy-free 1-D path.
    x2 = jax.random.uniform(jax.random.PRNGKey(1), (3, 5, 7, 9),
                            dtype=jnp.float32, minval=-1.0, maxval=1.0)
    y2 = jax.block_until_ready(fsu_hardsigmoid(x2))
    ref2 = (x2 + 1.0) * 0.5
    assert y2.shape == x2.shape and jnp.allclose(y2, ref2, atol=1e-6), \
        "mismatch vs reference (ragged path)"

    # bf16 exercises the dtype-aware sublane / tile sizing.
    x3 = jax.random.uniform(jax.random.PRNGKey(2), (4, 16, 32),
                            dtype=jnp.bfloat16, minval=-1.0, maxval=1.0)
    y3 = jax.block_until_ready(fsu_hardsigmoid(x3))
    ref3 = (x3.astype(jnp.float32) + 1.0) * 0.5
    assert y3.shape == x3.shape and y3.dtype == x3.dtype
    assert jnp.allclose(y3.astype(jnp.float32), ref3, atol=1e-2), \
        "mismatch vs reference (bf16 path)"

    print("KERNEL_OK")
</pallas_src>

<mosaic_0001>
module attributes {stable_mosaic.version = 11 : i64} {
  func.func @_hardsigmoid_kernel(%arg0: i32, %arg1: memref<8x256xf32, #tpu.memory_space<vmem>>, %arg2: memref<8x256xf32, #tpu.memory_space<vmem>>) attributes {dimension_semantics = [#tpu.dimension_semantics<parallel>], iteration_bounds = array<i64: 1>, scalar_prefetch = 0 : i64, scratch_operands = 0 : i64, tpu.core_type = #tpu.core_type<tc>, window_params = [{transform_indices = @transform_0, window_bounds = array<i64: 8, 256>}, {transform_indices = @transform_1, window_bounds = array<i64: 8, 256>}]} {
    %c0 = arith.constant 0 : index
    %c0_0 = arith.constant 0 : index
    %0 = vector.load %arg1[%c0, %c0_0] : memref<8x256xf32, #tpu.memory_space<vmem>>, vector<8x256xf32>
    %cst = arith.constant 5.000000e-01 : f32
    %1 = vector.broadcast %cst : f32 to vector<8x256xf32>
    %2 = arith.mulf %0, %1 : vector<8x256xf32>
    %cst_1 = arith.constant 5.000000e-01 : f32
    %3 = vector.broadcast %cst_1 : f32 to vector<8x256xf32>
    %4 = arith.addf %2, %3 : vector<8x256xf32>
    %c0_2 = arith.constant 0 : index
    %c0_3 = arith.constant 0 : index
    %5 = vector.load %arg2[%c0_2, %c0_3] : memref<8x256xf32, #tpu.memory_space<vmem>>, vector<8x256xf32>
    tpu.vector_store %arg2[%c0_2, %c0_3], %4 {strides = array<i32>} : memref<8x256xf32, #tpu.memory_space<vmem>>, vector<8x256xf32>,
    return
  }
  func.func @transform_0(%arg0: i32) -> (i32, i32) {
    %c0_i32 = arith.constant 0 : i32
    %c0_i32_0 = arith.constant 0 : i32
    return %arg0, %c0_i32 : i32, i32
  }
  func.func @transform_1(%arg0: i32) -> (i32, i32) {
    %c0_i32 = arith.constant 0 : i32
    %c0_i32_0 = arith.constant 0 : i32
    return %arg0, %c0_i32 : i32, i32
  }
}

</mosaic_0001>

<bundles_post_ra>
// kernel: tpu_custom_call.1
= control target key start
LH: loop header
LB: loop body
LE: loop exit
PB: predicated region body
PF: predicated region fallthrough
CT: control target
= control target key end

     0   :  { %6 = vsyncpa [#allocation3], 0  ;;  %s130_s0 = inlined_call_operand.hbm [shape: f32[8,256], index: 0, kind: input, shape index: {}]   ;;  %s131_s1 = inlined_call_operand.hbm [shape: f32[8,256], index: 1, kind: output, shape index: {}]  }
   0x1   :  { %7 = vsyncpa [#allocation4], 0  ;;  %s94_s6 = smov [#allocation2]   ;;  %s46_s10 = scalar_lea.hbm %s130_s0, 256 }
   0x2   :  { %s14_s7 = sshll.u32 %s94_s6, 4  ;;  %p47_p0 = scmp.ne.s32.totalorder %s130_s0, %s46_s10  ;;  %s15_s7 = int_to_ptr.vmem [resolvable:$true] %s14_s7 }
   0x3   :  { %p50_p1 = scmp.lt.u32.totalorder %s46_s10, %s130_s0 }
   0x5   :  { %p52_p2 = pnand %p50_p1, %p47_p0 }
   0x7   :  { %55 = shalt.err (!%p52_p2)
}
   0x8   :  { %s56_s15 = scalar_lea.vmem %s15_s7, 256  ;;  %p61_p4 = scmp.lt.s32.totalorder %s15_s7, %s15_s7 }
   0x9   :  { %p57_p3 = scmp.ne.s32.totalorder %s15_s7, %s56_s15  ;;  %p62_p5 = scmp.lt.s32.totalorder %s56_s15, %s56_s15 }
   0xb   :  { %p63_p6 = por %p62_p5, %p61_p4 }
   0xd   :  { %p64_p7 = pnand %p63_p6, %p57_p3 }
   0xf   :  { %67 = shalt.err (!%p64_p7)
}
  0x10   :  { %17 = dma.hbm_to_vmem [thread:$0]  %s130_s0, 256, %s15_s7, [#allocation3]  }
  0x11   :  { %90 = dma.done.wait [#allocation3], 256  }
  0x12   :  { %91 = vsyncadd [#allocation3], 4294967040  ;;  %v21_v0 = vld [vmem:[#allocation2] sm:$0xff]  ;;  %v22_v1 = vld [vmem:[#allocation2 + $0x8] sm:$0xff]  ;;  %s95_s18 = smov [#allocation5]  }
  0x13   :  { %s35_s19 = sshll.u32 %s95_s18, 4  ;;  %v23_v2 = vmul.f32 0.5, %v21_v0  ;;  %v24_v3 = vmul.f32 0.5, %v22_v1  ;;  %s36_s19 = int_to_ptr.vmem [resolvable:$true] %s35_s19 }
  0x14   :  { %s68_s20 = scalar_lea.vmem %s36_s19, 256  ;;  %p73_p9 = scmp.lt.s32.totalorder %s36_s19, %s36_s19 }
  0x15   :  { %v25_v4 = vadd.f32 0.5, %v23_v2  ;;  %v26_v5 = vadd.f32 0.5, %v24_v3  ;;  %p69_p8 = scmp.ne.s32.totalorder %s36_s19, %s68_s20  ;;  %p74_p10 = scmp.lt.s32.totalorder %s68_s20, %s68_s20 }
  0x17   :  { %27 = vst [vmem:[#allocation5] sm:$0xff] %v25_v4  ;;  %28 = vst [vmem:[#allocation5 + $0x8] sm:$0xff] %v26_v5  ;;  %p75_p11 = por %p74_p10, %p73_p9 }
  0x19   :  { %p76_p12 = pnand %p75_p11, %p69_p8 }
  0x1b   :  { %79 = shalt.err (!%p76_p12)
}
  0x1c   :  { %s80_s22 = scalar_lea.hbm %s131_s1, 256 }
  0x1d   :  { %p81_p13 = scmp.ne.s32.totalorder %s131_s1, %s80_s22  ;;  %p84_p0 = scmp.lt.u32.totalorder %s80_s22, %s131_s1 }
  0x1f   :  { %p86_p1 = pnand %p84_p0, %p81_p13 }
  0x21   :  { %89 = shalt.err (!%p86_p1)
}
  0x22   :  { %38 = dma.vmem_to_hbm [thread:$0]  %s36_s19, 256, %s131_s1, [#allocation4]  }
  0x23   :  { %92 = dma.done.wait [#allocation4], 256  }
  0x24   :  { %93 = vsyncadd [#allocation4], 4294967040 }
  0x25   :  { %42 = vsyncpa [#allocation3], 1 }
  0x26   :  { %43 = vsyncpa [#allocation4], 1 }

</bundles_post_ra>
